<compile_context>
chip_gen: v7x
topology: tpu7x:2x2x1
jax: 0.10.0
libtpu: 0.0.40
codegen_flags: <defaults>
</compile_context>

<pallas_src>
import functools

import numpy as np
import jax
import jax.numpy as jnp
from jax.experimental import pallas as pl
from jax.experimental.pallas import tpu as pltpu

CLIP_DEFAULT_MEAN = np.array([0.485, 0.456, 0.406], dtype=np.float32)
CLIP_DEFAULT_STD = np.array([0.229, 0.224, 0.225], dtype=np.float32)


# ---------------------------------------------------------------------------
# Host-side glue: PIL-style antialiased bicubic resize (+ center crop) weights.
# ---------------------------------------------------------------------------
def _cubic(x, a=-0.5):
    x = np.abs(x)
    return np.where(
        x < 1.0,
        ((a + 2.0) * x - (a + 3.0)) * x * x + 1.0,
        np.where(x < 2.0, (((x - 5.0) * x + 8.0) * x - 4.0) * a, 0.0),
    )


def _resize_crop_matrix(in_size, out_size, crop_off, crop_len):
    """Rows [crop_off, crop_off+crop_len) of the (out_size, in_size) antialiased
    bicubic resize matrix (i.e. resize fused with the subsequent crop)."""
    scale = in_size / out_size
    filterscale = max(scale, 1.0)          # antialias when downsampling
    support = 2.0 * filterscale            # cubic kernel support = 2
    W = np.zeros((crop_len, in_size), dtype=np.float32)
    for r in range(crop_len):
        i = r + crop_off
        center = (i + 0.5) * scale
        lo = int(np.floor(center - support))
        hi = int(np.ceil(center + support))
        js = np.arange(max(lo, 0), min(hi + 1, in_size))
        w = _cubic((js + 0.5 - center) / filterscale)
        s = w.sum()
        if s != 0:
            w = w / s
        W[r, js] = w.astype(np.float32)
    return W


def _resize_geometry(Hin, Win, S):
    """torchvision Resize(int) (shorter edge -> S) followed by CenterCrop(S)."""
    if Hin <= Win:
        out_h = S
        out_w = max(S, int(S * Win / Hin))
    else:
        out_w = S
        out_h = max(S, int(S * Hin / Win))
    top = int(round((out_h - S) / 2.0))
    left = int(round((out_w - S) / 2.0))
    return out_h, out_w, top, left


@functools.lru_cache(maxsize=None)
def _build_transform_constants(Hin, Win, C, S, is_mask):
    out_h, out_w, top, left = _resize_geometry(Hin, Win, S)
    wy = _resize_crop_matrix(Hin, out_h, top, S)    # (S, Hin)
    wx = _resize_crop_matrix(Win, out_w, left, S)   # (S, Win)
    wxt = np.ascontiguousarray(wx.T)                # (Win, S)
    if is_mask:
        scale = np.full((C,), 1.0 / 255.0, dtype=np.float32)
        bias = np.zeros((C,), dtype=np.float32)
    else:
        scale = (1.0 / (255.0 * CLIP_DEFAULT_STD)).astype(np.float32)
        bias = (-CLIP_DEFAULT_MEAN / CLIP_DEFAULT_STD).astype(np.float32)
    return wy, wxt, scale, bias


def _pick_tile_batch(B, bytes_per_image, vmem_budget=12 * 1024 * 1024, max_tb=16):
    """Images per grid step: amortize per-step overhead, stay under a VMEM
    budget (double-buffered input), keep >=2 grid steps for v7x's dual TCs."""
    cap = max(1, int(vmem_budget // max(1, 2 * bytes_per_image)))
    cap = min(cap, max_tb)
    if B >= 2:
        cap = min(cap, B // 2)
    cap = max(cap, 1)
    tb = 1
    for d in range(1, cap + 1):
        if B % d == 0:
            tb = d
    return tb


# ---------------------------------------------------------------------------
# Pallas kernel.
# ---------------------------------------------------------------------------
def _clip_transform_kernel(x_ref, k_ref, wy_ref, bias_ref, o_ref):
    # x_ref   : (TB, Hin, Win*C)  raw pixel values (bf16 or f32)
    # k_ref   : (Win*C, S*C)      kron(WxT, diag(1/(255*std)))  f32
    # wy_ref  : (S, Hin)          height resize weights          f32
    # bias_ref: (1, S*C)          per-channel -mean/std, tiled   f32
    # o_ref   : (TB, S, S*C)      normalized output              f32
    kmat = k_ref[...]
    wy = wy_ref[...]
    S, SC = o_ref.shape[1], o_ref.shape[2]
    bias = jnp.broadcast_to(bias_ref[...], (S, SC))      # hoisted out of the loop
    for b in range(x_ref.shape[0]):                      # static unroll, TB is small
        img = x_ref[b].astype(jnp.float32)               # (Hin, Win*C)
        tmp = jnp.dot(img, kmat, preferred_element_type=jnp.float32)   # (Hin, S*C)
        res = jnp.dot(wy, tmp, preferred_element_type=jnp.float32)     # (S,   S*C)
        o_ref[b] = res + bias


# ---------------------------------------------------------------------------
# Wrapper.
# ---------------------------------------------------------------------------
def clip_image_transform(images_nhwc, image_size=224, is_mask=False):
    """images_nhwc: (B, H, W, C) with raw pixel values in [0, 255] (PIL layout).

    Returns (B, C, image_size, image_size) float32 (NCHW, torch convention).
    """
    images_nhwc = jnp.asarray(images_nhwc)
    B, Hin, Win, C = images_nhwc.shape
    S = int(image_size)
    assert is_mask or C == CLIP_DEFAULT_MEAN.shape[0], "normalization expects 3 channels"

    wy, wxt, scale, bias = _build_transform_constants(Hin, Win, C, S, bool(is_mask))
    kmat = jnp.asarray(np.kron(wxt, np.diag(scale)))          # (Win*C, S*C)
    wy_j = jnp.asarray(wy)                                    # (S, Hin)
    bias_row = jnp.asarray(np.tile(bias, S)[None, :])         # (1, S*C)

    # Free contiguous merge of (W, C) -> lane-dense last dim; no full-res transpose.
    x = images_nhwc.reshape(B, Hin, Win * C)
    if x.dtype not in (jnp.bfloat16, jnp.float32):
        x = x.astype(jnp.bfloat16)   # 0..255 integers are exact in bf16

    WC, SC = Win * C, S * C
    TB = _pick_tile_batch(B, Hin * WC * x.dtype.itemsize)
    grid = (B // TB,)

    flops = 2 * B * (Hin * WC * SC + S * Hin * SC)
    bytes_accessed = (B * Hin * WC * x.dtype.itemsize + B * S * SC * 4
                      + kmat.size * 4 + wy_j.size * 4 + bias_row.size * 4)

    out = pl.pallas_call(
        _clip_transform_kernel,
        out_shape=jax.ShapeDtypeStruct((B, S, SC), jnp.float32),
        grid=grid,
        in_specs=[
            pl.BlockSpec((TB, Hin, WC), lambda i: (i, 0, 0)),   # images
            pl.BlockSpec((WC, SC), lambda i: (0, 0)),           # kron weight
            pl.BlockSpec((S, Hin), lambda i: (0, 0)),           # Wy
            pl.BlockSpec((1, SC), lambda i: (0, 0)),            # bias row
        ],
        out_specs=pl.BlockSpec((TB, S, SC), lambda i: (i, 0, 0)),
        compiler_params=pltpu.CompilerParams(
            dimension_semantics=("parallel",),
            vmem_limit_bytes=48 * 1024 * 1024,
        ),
        cost_estimate=pl.CostEstimate(
            flops=flops, transcendentals=0, bytes_accessed=bytes_accessed),
    )(x, kmat, wy_j, bias_row)

    # Tiny layout fixup on the resized result only: (B, S, S, C) -> (B, C, S, S).
    return jnp.transpose(out.reshape(B, S, S, C), (0, 3, 1, 2))


# ---------------------------------------------------------------------------
# Reference (numpy float64) for correctness checks.
# ---------------------------------------------------------------------------
def _reference(images_nhwc_np, image_size, is_mask=False):
    x = np.asarray(images_nhwc_np, dtype=np.float64)
    B, Hin, Win, C = x.shape
    S = int(image_size)
    wy, wxt, scale, bias = _build_transform_constants(Hin, Win, C, S, bool(is_mask))
    r = np.einsum("sh,bhwc,wt->bcst", wy.astype(np.float64), x, wxt.astype(np.float64))
    return r * scale.reshape(1, C, 1, 1) + bias.reshape(1, C, 1, 1)


if __name__ == "__main__":
    key = jax.random.PRNGKey(0)
    k1, k2 = jax.random.split(key)
    S = 16

    # Square inputs (PIL-style HWC, raw 0..255 pixel values).
    B, H, W, C = 2, 32, 32, 3
    imgs_np = np.round(
        np.asarray(jax.random.uniform(k1, (B, H, W, C), minval=0.0, maxval=255.0))
    ).astype(np.float32)
    imgs = jnp.asarray(imgs_np, dtype=jnp.bfloat16)   # integers 0..255 exact in bf16

    out = jax.block_until_ready(clip_image_transform(imgs, image_size=S))
    assert out.shape == (B, C, S, S), out.shape
    np.testing.assert_allclose(
        np.asarray(out), _reference(imgs_np, S, False), atol=1e-3, rtol=1e-3)

    # Mask path (resize + ToTensor only, no Normalize).
    mask_out = jax.block_until_ready(clip_image_transform(imgs, image_size=S, is_mask=True))
    np.testing.assert_allclose(
        np.asarray(mask_out), _reference(imgs_np, S, True), atol=1e-3, rtol=1e-3)

    # Non-square input: shorter-edge resize + center crop path.
    B2, H2, W2 = 2, 40, 32
    imgs2_np = np.round(
        np.asarray(jax.random.uniform(k2, (B2, H2, W2, C), minval=0.0, maxval=255.0))
    ).astype(np.float32)
    imgs2 = jnp.asarray(imgs2_np, dtype=jnp.bfloat16)
    out2 = jax.block_until_ready(clip_image_transform(imgs2, image_size=S))
    assert out2.shape == (B2, C, S, S), out2.shape
    np.testing.assert_allclose(
        np.asarray(out2), _reference(imgs2_np, S, False), atol=1e-3, rtol=1e-3)

    print("KERNEL_OK")
</pallas_src>

<mosaic_0001>
module attributes {stable_mosaic.version = 11 : i64} {
  func.func @_clip_transform_kernel(%arg0: i32, %arg1: memref<1x32x96xbf16, #tpu.memory_space<vmem>>, %arg2: memref<96x48xf32, #tpu.memory_space<vmem>>, %arg3: memref<16x32xf32, #tpu.memory_space<vmem>>, %arg4: memref<1x48xf32, #tpu.memory_space<vmem>>, %arg5: memref<1x16x48xf32, #tpu.memory_space<vmem>>) attributes {dimension_semantics = [#tpu.dimension_semantics<parallel>], iteration_bounds = array<i64: 2>, scalar_prefetch = 0 : i64, scratch_operands = 0 : i64, tpu.core_type = #tpu.core_type<tc>, window_params = [{transform_indices = @transform_0, window_bounds = array<i64: 1, 32, 96>}, {pipeline_mode = #tpu.pipeline_mode<synchronous>, transform_indices = @transform_1, window_bounds = array<i64: 96, 48>}, {pipeline_mode = #tpu.pipeline_mode<synchronous>, transform_indices = @transform_2, window_bounds = array<i64: 16, 32>}, {pipeline_mode = #tpu.pipeline_mode<synchronous>, transform_indices = @transform_3, window_bounds = array<i64: 1, 48>}, {transform_indices = @transform_4, window_bounds = array<i64: 1, 16, 48>}]} {
    %c0 = arith.constant 0 : index
    %c0_0 = arith.constant 0 : index
    %0 = vector.load %arg2[%c0, %c0_0] : memref<96x48xf32, #tpu.memory_space<vmem>>, vector<96x48xf32>
    %c0_1 = arith.constant 0 : index
    %c0_2 = arith.constant 0 : index
    %1 = vector.load %arg3[%c0_1, %c0_2] : memref<16x32xf32, #tpu.memory_space<vmem>>, vector<16x32xf32>
    %c0_3 = arith.constant 0 : index
    %c0_4 = arith.constant 0 : index
    %2 = vector.load %arg4[%c0_3, %c0_4] : memref<1x48xf32, #tpu.memory_space<vmem>>, vector<1x48xf32>
    %3 = vector.shape_cast %2 : vector<1x48xf32> to vector<1x48xf32>
    %4 = vector.broadcast %3 : vector<1x48xf32> to vector<16x48xf32>
    %c0_5 = arith.constant 0 : index
    %c0_6 = arith.constant 0 : index
    %c0_7 = arith.constant 0 : index
    %5 = vector.load %arg1[%c0_5, %c0_6, %c0_7] : memref<1x32x96xbf16, #tpu.memory_space<vmem>>, vector<1x32x96xbf16>
    %6 = vector.shape_cast %5 : vector<1x32x96xbf16> to vector<32x96xbf16>
    %7 = arith.extf %6 : vector<32x96xbf16> to vector<32x96xf32>
    %cst = arith.constant dense<0.000000e+00> : vector<32x48xf32>
    %8 = tpu.matmul %7, %0, %cst {dimension_numbers = #tpu.dot_dimension_numbers<[1], [0], [0], [1], [0, 0, 1, 1], [], []>} : vector<32x96xf32>, vector<96x48xf32>, vector<32x48xf32> -> vector<32x48xf32>
    %cst_8 = arith.constant dense<0.000000e+00> : vector<16x48xf32>
    %9 = tpu.matmul %1, %8, %cst_8 {dimension_numbers = #tpu.dot_dimension_numbers<[1], [0], [0], [1], [0, 0, 1, 1], [], []>} : vector<16x32xf32>, vector<32x48xf32>, vector<16x48xf32> -> vector<16x48xf32>
    %10 = arith.addf %9, %4 : vector<16x48xf32>
    %c0_9 = arith.constant 0 : index
    %c0_10 = arith.constant 0 : index
    %c0_11 = arith.constant 0 : index
    %11 = vector.load %arg5[%c0_9, %c0_10, %c0_11] : memref<1x16x48xf32, #tpu.memory_space<vmem>>, vector<1x16x48xf32>
    %12 = vector.shape_cast %11 : vector<1x16x48xf32> to vector<16x48xf32>
    %13 = vector.shape_cast %10 : vector<16x48xf32> to vector<1x16x48xf32>
    tpu.vector_store %arg5[%c0_9, %c0_10, %c0_11], %13 {strides = array<i32>} : memref<1x16x48xf32, #tpu.memory_space<vmem>>, vector<1x16x48xf32>,
    return
  }
  func.func @transform_0(%arg0: i32) -> (i32, i32, i32) {
    %c0_i32 = arith.constant 0 : i32
    %c0_i32_0 = arith.constant 0 : i32
    %c0_i32_1 = arith.constant 0 : i32
    return %arg0, %c0_i32, %c0_i32_0 : i32, i32, i32
  }
  func.func @transform_1(%arg0: i32) -> (i32, i32) {
    %c0_i32 = arith.constant 0 : i32
    %c0_i32_0 = arith.constant 0 : i32
    %c0_i32_1 = arith.constant 0 : i32
    return %c0_i32, %c0_i32_0 : i32, i32
  }
  func.func @transform_2(%arg0: i32) -> (i32, i32) {
    %c0_i32 = arith.constant 0 : i32
    %c0_i32_0 = arith.constant 0 : i32
    %c0_i32_1 = arith.constant 0 : i32
    return %c0_i32, %c0_i32_0 : i32, i32
  }
  func.func @transform_3(%arg0: i32) -> (i32, i32) {
    %c0_i32 = arith.constant 0 : i32
    %c0_i32_0 = arith.constant 0 : i32
    %c0_i32_1 = arith.constant 0 : i32
    return %c0_i32, %c0_i32_0 : i32, i32
  }
  func.func @transform_4(%arg0: i32) -> (i32, i32, i32) {
    %c0_i32 = arith.constant 0 : i32
    %c0_i32_0 = arith.constant 0 : i32
    %c0_i32_1 = arith.constant 0 : i32
    return %arg0, %c0_i32, %c0_i32_0 : i32, i32, i32
  }
}

</mosaic_0001>

<bundles_post_ra>
// kernel: tpu_custom_call.1
= control target key start
LH: loop header
LB: loop body
LE: loop exit
PB: predicated region body
PF: predicated region fallthrough
CT: control target
= control target key end

     0   :  { %9 = vsyncpa [#allocation3], 0  ;;  %s894_s0 = inlined_call_operand.vmem [shape: bf16[2,32,96], index: 0, kind: input, shape index: {}]   ;;  %s895_s1 = inlined_call_operand.vmem [shape: f32[96,48], index: 1, kind: input, shape index: {}]   ;;  %s896_s2 = inlined_call_operand.vmem [shape: f32[16,32], index: 2, kind: input, shape index: {}]   ;;  %s897_s3 = inlined_call_operand.vmem [shape: f32[1,48], index: 3, kind: input, shape index: {}]   ;;  %s898_s4 = inlined_call_operand.hbm [shape: f32[2,16,48], index: 4, kind: output, shape index: {}]  }
   0x1   :  { %11 = vsyncpa [#allocation3 + $0x1], 0  ;;  %s742_s15 = smov 0   ;;  %s744_s16 = smov 0  }
   0x2   :  { %s746_s17 = smov 0   ;;  %s748_s18 = smov 0  }
   0x3 LB: > { %s763_s19 = sadd.s32 4294967295, %s712_s18   ;;  %s484_s20 = sadd.s32 4294967294, %s712_s18   ;;  %s712_s18 = sphi %s748_s18, %s904_s18   ;;  %s708_s17 = sphi %s746_s17, %s903_s17   ;;  %s704_s16 = sphi %s744_s16, %s902_s16   ;;  %s700_s15 = sphi %s742_s15, %s901_s15  }
   0x4   : > { %s767_s21 = sadd.s32 1, %s712_s18   ;;  %s113_s22 = sadd.s32 1, %s708_s17 }
   0x5   : > { %s110_s23 = ssub.s32 %s712_s18, %s767_s21  ;;  %p123_p0 = scmp.ne.s32.totalorder %s708_s17, %s704_s16 }
   0x6   : > { %p111_p1 = scmp.eq.s32.totalorder %s110_s23, 0  ;;  %p124_p2 = scmp.eq.s32.totalorder %s763_s19, 1 }
   0x7   : > { %p129_p3 = scmp.ne.s32.totalorder %s704_s16, %s700_s15  ;;  %p130_p4 = scmp.eq.s32.totalorder %s484_s20, 1 }
   0x8   : > { %s778_s24 = scalar_select %p111_p1, %s708_s17, %s113_s22  }
   0x9   : > { %p780_p5 = por %p124_p2, %p123_p0  ;;  %p784_p6 = por %p130_p4, %p129_p3 }
   0xa   : > { %p487_p7 = scmp.ge.s32.totalorder %s712_s18, 1  ;;  %p165_p8 = scmp.lt.s32.totalorder %s712_s18, 3 }
   0xc   : > { %p166_p9 = pnand %p487_p7, %p165_p8 }
   0xd   : > { %v196_v0 = vld [vmem:[%s895_s1] sm:$0xff] (!%p166_p9)  ;;  %v197_v1 = vld [vmem:[%s895_s1 + $0x8] sm:$0xff] (!%p166_p9)  ;;  %v198_v2 = vld [vmem:[%s895_s1 + $0x10] sm:$0xff] (!%p166_p9)  ;;  %p191_p10 = scmp.lt.s32.totalorder (!%p166_p9), %s763_s19, 1  ;;  %vm225_vm0 = vcmask (!%p166_p9), 785408   ;;  %vm323_vm1 = vcmask (!%p166_p9), 261120  }
   0xe   : > { %169 = sbr.rel (%p166_p9) target bundleno = 493 (0x1ed), region = 36  ;;  %v577_v3 = vpack.c.bf16 (!%p166_p9), %v197_v1, %v196_v0  ;;  %v199_v4 = vld [vmem:[%s895_s1 + $0x18] sm:$0xff] (!%p166_p9)  ;;  %v200_v6 = vld [vmem:[%s895_s1 + $0x20] sm:$0xff] (!%p166_p9)  ;;  %v201_v7 = vld [vmem:[%s895_s1 + $0x28] sm:$0xff] (!%p166_p9)  ;;  %s504_s6 = sshll.u32 (!%p166_p9), %s763_s19, 8  ;;  %vm405_vm2 = vcmask (!%p166_p9), 392192  }
   0xf   : > { %v581_v5 = vpack.c.bf16 (!%p166_p9), %v199_v4, %v198_v2  ;;  %v585_v8 = vpack.c.bf16 (!%p166_p9), %v201_v7, %v200_v6  ;;  %v202_v9 = vld [vmem:[%s895_s1 + $0x30] sm:$0xff] (!%p166_p9)  ;;  %v203_v10 = vld [vmem:[%s895_s1 + $0x38] sm:$0xff] (!%p166_p9)  ;;  %v204_v14 = vld [vmem:[%s895_s1 + $0x40] sm:$0xff] (!%p166_p9)  ;;  %s851_s9 = scalar_lea.hbm (!%p166_p9), %s898_s4, %s504_s6  ;;  %s714_s11 = smov (!%p166_p9), [#allocation2]  }
  0x10   : > { %578 = vmatprep.subr.bf16.mxu0 (!%p166_p9), %v577_v3  ;;  %v589_v13 = vpack.c.bf16 (!%p166_p9), %v203_v10, %v202_v9  ;;  %v205_v15 = vld [vmem:[%s895_s1 + $0x48] sm:$0xff] (!%p166_p9)  ;;  %v206_v17 = vld [vmem:[%s895_s1 + $0x50] sm:$0xff] (!%p166_p9)  ;;  %v207_v18 = vld [vmem:[%s895_s1 + $0x58] sm:$0xff] (!%p166_p9)  ;;  %s654_s12 = sshll.u32 (!%p166_p9), %s714_s11, 4  ;;  %s655_s12 = int_to_ptr.vmem [resolvable:$false] %s654_s12 }
  0x11   : > { %580 = vmatpush3.bf16.msra.mxu0 (!%p166_p9), %v577_v3  ;;  %v593_v16 = vpack.c.bf16 (!%p166_p9), %v205_v15, %v204_v14  ;;  %v597_v19 = vpack.c.bf16 (!%p166_p9), %v207_v18, %v206_v17  ;;  %v208_v24 = vld [vmem:[%s896_s2] sm:$0xff] (!%p166_p9)  ;;  %v209_v31 = vld [vmem:[%s896_s2 + $0x8] sm:$0xff] (!%p166_p9) }
  0x12   : > { %582 = vmatprep.subr.bf16.mxu0 (!%p166_p9), %v581_v5  ;;  %574 = vmatprep.mubr.msk.f32.mxu1 (!%p166_p9), %vm323_vm1, %v208_v24  ;;  %v491_v32 = vld [vmem:[%s897_s3] ss:$0 sm:$0xff] (!%p166_p9) }
  0x15   : > { %s192_s13 = scalar_select %p191_p10, %s763_s19, 1  ;;  %584 = vmatpush3.bf16.msra.mxu0 %v581_v5 }
  0x16   : > { %586 = vmatprep.subr.bf16.mxu0 %v585_v8 }
  0x17   : > { %s503_s14 = sshll.u32 %s192_s13, 4  ;;  %s656_s13 = scalar_lea.vmem %s655_s12, 512 }
  0x18   : > { %s195_s23 = scalar_lea.vmem %s894_s0, %s503_s14 }
  0x19   : > { %v506_v11 = vld [vmem:[%s195_s23] sm:$0xff]   ;;  %588 = vmatpush3.bf16.msra.mxu0 %v585_v8  ;;  %v513_v20 = vld [vmem:[%s195_s23 + $0x8] sm:$0xff]   ;;  %s188_s23 = sand.u32 1, %s704_s16  }
  0x1a   : > { %v507_v12 = vunpack.c.l.bf16 %v506_v11  ;;  %590 = vmatprep.subr.bf16.mxu0 %v589_v13  ;;  %v508_v21 = vunpack.c.h.bf16 %v506_v11  ;;  %v511_v22 = vunpack.c.l.bf16 %v513_v20  ;;  %v512_v23 = vunpack.c.h.bf16 %v513_v20  ;;  %s488_s27 = sshll.u32 %s188_s23, 4  ;;  %s853_s10 = scalar_lea.sflag [#allocation3], %s188_s23 }
  0x1b   : > { %s190_s30 = scalar_lea.vmem [#allocation2], %s488_s27 }
  0x1c   : > { %560 = vmatprep.mubr.msk.f32.mxu0 %vm225_vm0, %v507_v12  ;;  %s422_s5 = sshll.u32 %s190_s30, 4  ;;  %s846_s5 = int_to_ptr.vmem [resolvable:$true] %s422_s5 }
  0x1d   : > { %592 = vmatpush3.bf16.msra.mxu0 %v589_v13  ;;  %s650_s19 = scalar_lea.vmem %s846_s5, 256  ;;  %p657_p0 = scmp.lt.s32.totalorder %s846_s5, %s655_s12 }
  0x1e   : > { %594 = vmatprep.subr.bf16.mxu0 %v593_v16  ;;  %p651_p11 = scmp.ne.s32.totalorder %s846_s5, %s650_s19  ;;  %p658_p1 = scmp.lt.s32.totalorder %s656_s13, %s650_s19 }
  0x20   : > { %p652_p12 = pnand %p651_p11, %p780_p5  ;;  %p659_p2 = por %p658_p1, %p657_p0 }
  0x21   : > { %596 = vmatpush3.bf16.msra.mxu0 %v593_v16 }
  0x22   : > { %598 = vmatprep.subr.bf16.mxu0 %v597_v19  ;;  %p653_p13 = pneg %p652_p12 }
  0x24   : > { %p660_p3 = pnand %p659_p2, %p653_p13 }
  0x25   : > { %600 = vmatpush3.bf16.msra.mxu0 %v597_v19 }
  0x28   : > { %561 = vmatmul.mubr.msk.f32.vlgmr.msra.gmra.mrb[0].mxu0 %vm225_vm0, %v508_v21 }
  0x29   : > { %563 = vmatprep.mubr.msk.f32.mxu0 %vm225_vm0, %v511_v22 }
  0x2c   : > { %564 = vmatmul.mubr.msk.f32.gmra.mrb[2].mxu0 %vm225_vm0, %v512_v23 }
  0xfb   : > { %v562_v25 = vpop.f32.mrb[0].mxu0 }
  0xfc   : > { %v304_v26 = vpop.f32.mrb[1].mxu0 }
  0xfd   : > { %v601_v27 = vpack.c.bf16 %v562_v25, %v304_v26 }
  0xff   : > { %v565_v28 = vpop.f32.mrb[2].mxu0  ;;  %602 = vmatprep.subr.bf16.mxu1 %v601_v27 }
 0x100   : > { %v314_v29 = vpop.f32.mrb[3].mxu0  ;;  %604 = vmatpush3.bf16.msra.mxu1 %v601_v27 }
 0x101   : > { %v605_v30 = vpack.c.bf16 %v565_v28, %v314_v29 }
 0x103   : > { %606 = vmatprep.subr.bf16.mxu1 %v605_v30 }
 0x104   : > { %608 = vmatpush3.bf16.msra.mxu1 %v605_v30 }
 0x107   : > { %575 = vmatmul.mubr.msk.f32.vlgmr.msra.gmra.mrb[0].mxu1 %vm323_vm1, %v209_v31 }
 0x1da   : > { %v576_v33 = vpop.f32.mrb[0].mxu1 }
 0x1db   : > { %v402_v34 = vadd.f32 %v576_v33, %v491_v32  ;;  %v396_v35 = vpop.f32.mrb[1].mxu1 }
 0x1dc   : > { %v397_v36 = vadd.f32 %v491_v32, %v396_v35 }
 0x1dd   : > { %407 = vst.msk [vmem:[%s190_s30 + $0x8] sm:$0xff] %vm405_vm2, %v402_v34 }
 0x1de   : > { %406 = vst.msk [vmem:[%s190_s30] sm:$0xff] %vm405_vm2, %v397_v36 }
 0x1df   : > { %663 = shalt.err (!%p660_p3)
}
 0x1e0   : > { %s664_s14 = scalar_lea.hbm %s851_s9, 256  ;;  %s668_s23 = scalar_lea.hbm %s898_s4, 512 }
 0x1e1   : > { %p665_p4 = scmp.ne.s32.totalorder %s851_s9, %s664_s14  ;;  %p669_p9 = scmp.lt.u32.totalorder %s851_s9, %s898_s4 }
 0x1e2   : > { %p670_p10 = scmp.lt.u32.totalorder %s668_s23, %s664_s14  ;;  %p672_p12 = scmp.lt.u32.totalorder %s664_s14, %s851_s9 }
 0x1e3   : > { %p666_p7 = pnand %p665_p4, %p780_p5 }
 0x1e4   : > { %p671_p11 = por %p670_p10, %p669_p9 }
 0x1e5   : > { %p667_p8 = pneg %p666_p7 }
 0x1e6   : > { %p673_p13 = por %p672_p12, %p671_p11 }
 0x1e8   : > { %p674_p0 = pnand %p673_p13, %p667_p8 }
 0x1ea   : > { %677 = shalt.err (!%p674_p0)
}
 0x1eb   : > { %s715_s29 = smov 128   ;;  %s716_s30 = smov 8  }
 0x1ec   : > { %609 = dma.vmem_to_hbm [thread:$0]  (%p780_p5), %s846_s5, 256, %s851_s9, %s853_s10, %s715_s29, %s715_s29, %s716_s30  }
 0x1ed PF: > { %p615_p1 = scmp.ge.s32.totalorder %s712_s18, 2  ;;  %s437_s6 = sand.u32 1, %s700_s15  }
 0x1ee   : > { %s438_s7 = scalar_lea.sflag [#allocation3], %s437_s6 }
 0x1ef   : > { %p612_p2 = pnand %p615_p1, %p784_p6 }
 0x1f1   : > { %695 = dma.done.wait (!%p612_p2), %s438_s7, 256  }
 0x1f2   : > { %697 = vsyncadd (!%p612_p2), %s438_s7, 4294967040  ;;  %p14_p3 = scmp.ge.s32.totalorder %s767_s21, 4   ;;  %s901_s15 = smov %s704_s16 }
 0x1f3   : > { %s902_s16 = smov %s708_s17  ;;  %s903_s17 = smov %s778_s24 }
 0x1f4   : > { %s904_s18 = smov %s767_s21  ;;  %16 = sbr.rel (!%p14_p3) target bundleno = 3 (0x3), region = 71 }
 0x1fb   :  { %443 = vsyncpa [#allocation3], 1 }
 0x1fc   :  { %445 = vsyncpa [#allocation3 + $0x1], 1 }

</bundles_post_ra>
